<compile_context>
chip_gen: v7x
topology: tpu7x:2x2x1
jax: 0.10.0
libtpu: 0.0.40
codegen_flags: <defaults>
</compile_context>

<pallas_src>
import jax
import jax.numpy as jnp
from jax.experimental import pallas as pl
from jax.experimental.pallas import tpu as pltpu

LANES = 128
SUBLANES = 8


def ode1_kernel(params_ref, xyz_ref, o_ref):
    # params_ref: SMEM (3,) f32 -> scalars a, b, c
    a = params_ref[0]
    b = params_ref[1]
    c = params_ref[2]
    # xyz_ref: VMEM (3, block_rows, 128) packed x/y/z tile
    # o_ref:   VMEM (block_rows, 128)
    o_ref[...] = a * xyz_ref[0] + b * xyz_ref[1] + c * xyz_ref[2]


def ode1_forward(params, x, y, z, *, max_block_rows=512):
    """params: (3,) f32 [a, b, c]; x, y, z: (N,) f32. Returns (N,) f32."""
    N = x.shape[0]
    dtype = x.dtype

    # Sublane/lane-dense tiling: rows is a multiple of 8, last dim is 128.
    rows = pl.cdiv(N, LANES)
    rows = ((rows + SUBLANES - 1) // SUBLANES) * SUBLANES
    block_rows = min(max_block_rows, rows)          # multiple of 8 by construction
    rows_pad = ((rows + block_rows - 1) // block_rows) * block_rows
    n_pad = rows_pad * LANES

    def to_tile(v):
        v = jnp.pad(v, (0, n_pad - N))              # zero-fill the tail
        return v.reshape(rows_pad, LANES)

    # Pack the three streams into one input -> one DMA per grid step.
    xyz = jnp.stack([to_tile(x), to_tile(y), to_tile(z)], axis=0)

    grid = (rows_pad // block_rows,)

    out = pl.pallas_call(
        ode1_kernel,
        out_shape=jax.ShapeDtypeStruct((rows_pad, LANES), dtype),
        grid=grid,
        in_specs=[
            pl.BlockSpec(memory_space=pltpu.SMEM),                      # a, b, c
            pl.BlockSpec((3, block_rows, LANES), lambda i: (0, i, 0)),  # packed x/y/z
        ],
        out_specs=pl.BlockSpec((block_rows, LANES), lambda i: (i, 0)),
        compiler_params=pltpu.CompilerParams(
            dimension_semantics=("parallel",),
        ),
    )(params, xyz)

    # Drop the zero padding to recover the exact (N,) result.
    return out.reshape(n_pad)[:N]


if __name__ == "__main__":
    # Deterministic parameter init (stand-in for torch.randn(()) x3).
    key = jax.random.PRNGKey(0)
    params = jax.random.normal(key, (3,), dtype=jnp.float32)  # [a, b, c]

    # Inputs consistent with the module: 1-D grids of 1000 points.
    N = 1000
    x = jnp.linspace(-10.0, 10.0, N, dtype=jnp.float32)
    y = jnp.linspace(-10.0, 10.0, N, dtype=jnp.float32)
    z = jnp.linspace(-10.0, 10.0, N, dtype=jnp.float32)

    force = ode1_forward(params, x, y, z)
    jax.block_until_ready(force)

    # Reference check in plain JAX.
    ref = params[0] * x + params[1] * y + params[2] * z
    assert force.shape == (N,)
    assert jnp.allclose(force, ref, atol=1e-5, rtol=1e-5)

    print("KERNEL_OK")
</pallas_src>

<mosaic_0001>
module attributes {stable_mosaic.version = 11 : i64} {
  func.func @ode1_kernel(%arg0: i32, %arg1: memref<3xf32, #tpu.memory_space<smem>>, %arg2: memref<3x8x128xf32, #tpu.memory_space<vmem>>, %arg3: memref<8x128xf32, #tpu.memory_space<vmem>>) attributes {dimension_semantics = [#tpu.dimension_semantics<parallel>], iteration_bounds = array<i64: 1>, scalar_prefetch = 0 : i64, scratch_operands = 0 : i64, tpu.core_type = #tpu.core_type<tc>, window_params = [{transform_indices = @transform_0, window_bounds = array<i64: 3>}, {transform_indices = @transform_1, window_bounds = array<i64: 3, 8, 128>}, {transform_indices = @transform_2, window_bounds = array<i64: 8, 128>}]} {
    %c0 = arith.constant 0 : index
    %0 = memref.load %arg1[%c0] : memref<3xf32, #tpu.memory_space<smem>>
    %c1 = arith.constant 1 : index
    %1 = memref.load %arg1[%c1] : memref<3xf32, #tpu.memory_space<smem>>
    %c2 = arith.constant 2 : index
    %2 = memref.load %arg1[%c2] : memref<3xf32, #tpu.memory_space<smem>>
    %c0_0 = arith.constant 0 : index
    %c0_1 = arith.constant 0 : index
    %c0_2 = arith.constant 0 : index
    %3 = vector.load %arg2[%c0_0, %c0_1, %c0_2] : memref<3x8x128xf32, #tpu.memory_space<vmem>>, vector<1x8x128xf32>
    %4 = vector.shape_cast %3 : vector<1x8x128xf32> to vector<8x128xf32>
    %5 = vector.broadcast %0 : f32 to vector<8x128xf32>
    %6 = arith.mulf %5, %4 : vector<8x128xf32>
    %c1_3 = arith.constant 1 : index
    %c0_4 = arith.constant 0 : index
    %c0_5 = arith.constant 0 : index
    %7 = vector.load %arg2[%c1_3, %c0_4, %c0_5] : memref<3x8x128xf32, #tpu.memory_space<vmem>>, vector<1x8x128xf32>
    %8 = vector.shape_cast %7 : vector<1x8x128xf32> to vector<8x128xf32>
    %9 = vector.broadcast %1 : f32 to vector<8x128xf32>
    %10 = arith.mulf %9, %8 : vector<8x128xf32>
    %11 = arith.addf %6, %10 : vector<8x128xf32>
    %c2_6 = arith.constant 2 : index
    %c0_7 = arith.constant 0 : index
    %c0_8 = arith.constant 0 : index
    %12 = vector.load %arg2[%c2_6, %c0_7, %c0_8] : memref<3x8x128xf32, #tpu.memory_space<vmem>>, vector<1x8x128xf32>
    %13 = vector.shape_cast %12 : vector<1x8x128xf32> to vector<8x128xf32>
    %14 = vector.broadcast %2 : f32 to vector<8x128xf32>
    %15 = arith.mulf %14, %13 : vector<8x128xf32>
    %16 = arith.addf %11, %15 : vector<8x128xf32>
    %c0_9 = arith.constant 0 : index
    %c0_10 = arith.constant 0 : index
    %17 = vector.load %arg3[%c0_9, %c0_10] : memref<8x128xf32, #tpu.memory_space<vmem>>, vector<8x128xf32>
    tpu.vector_store %arg3[%c0_9, %c0_10], %16 {strides = array<i32>} : memref<8x128xf32, #tpu.memory_space<vmem>>, vector<8x128xf32>,
    return
  }
  func.func @transform_0(%arg0: i32) -> i32 {
    %c0_i32 = arith.constant 0 : i32
    %c0_i32_0 = arith.constant 0 : i32
    return %c0_i32 : i32
  }
  func.func @transform_1(%arg0: i32) -> (i32, i32, i32) {
    %c0_i32 = arith.constant 0 : i32
    %c0_i32_0 = arith.constant 0 : i32
    %c0_i32_1 = arith.constant 0 : i32
    return %c0_i32, %arg0, %c0_i32_0 : i32, i32, i32
  }
  func.func @transform_2(%arg0: i32) -> (i32, i32) {
    %c0_i32 = arith.constant 0 : i32
    %c0_i32_0 = arith.constant 0 : i32
    return %arg0, %c0_i32 : i32, i32
  }
}

</mosaic_0001>

<bundles_post_ra>
// kernel: tpu_custom_call.1
= control target key start
LH: loop header
LB: loop body
LE: loop exit
PB: predicated region body
PF: predicated region fallthrough
CT: control target
= control target key end

     0   :  { %7 = vsyncpa [#allocation5], 0  ;;  %s193_s0 = inlined_call_operand.hbm [shape: f32[3], index: 0, kind: input, shape index: {}]   ;;  %s194_s1 = inlined_call_operand.hbm [shape: f32[3,8,128], index: 1, kind: input, shape index: {}]   ;;  %s195_s2 = inlined_call_operand.hbm [shape: f32[8,128], index: 2, kind: output, shape index: {}]  }
   0x1   :  { %8 = vsyncpa [#allocation3], 0 }
   0x2   :  { %9 = vsyncpa [#allocation4], 0  ;;  %s77_s11 = scalar_lea.hbm %s193_s0, 16 }
   0x3   :  { %p78_p0 = scmp.ne.s32.totalorder %s193_s0, %s77_s11  ;;  %p81_p1 = scmp.lt.u32.totalorder %s77_s11, %s193_s0 }
   0x5   :  { %p83_p2 = pnand %p81_p1, %p78_p0 }
   0x7   :  { %86 = shalt.err (!%p83_p2)
}
   0x8   :  { %s137_s16 = smov [#allocation2]   ;;  %s138_s19 = smov [#allocation6]  }
   0x9   :  { %17 = dma.hbm_to_smem %s193_s0, 16, %s137_s16, [#allocation5]  }
   0xa   :  { %s23_s20 = sshll.u32 %s138_s19, 4  ;;  %s87_s23 = scalar_lea.hbm %s194_s1, 384  ;;  %s24_s20 = int_to_ptr.vmem [resolvable:$true] %s23_s20 }
   0xb   :  { %p88_p3 = scmp.ne.s32.totalorder %s194_s1, %s87_s23  ;;  %p91_p4 = scmp.lt.u32.totalorder %s87_s23, %s194_s1 }
   0xd   :  { %p93_p5 = pnand %p91_p4, %p88_p3 }
   0xf   :  { %96 = shalt.err (!%p93_p5)
}
  0x10   :  { %s97_s28 = scalar_lea.vmem %s24_s20, 384  ;;  %p102_p7 = scmp.lt.s32.totalorder %s24_s20, %s24_s20 }
  0x11   :  { %p98_p6 = scmp.ne.s32.totalorder %s24_s20, %s97_s28  ;;  %p103_p8 = scmp.lt.s32.totalorder %s97_s28, %s97_s28 }
  0x13   :  { %p104_p9 = por %p103_p8, %p102_p7 }
  0x15   :  { %p105_p10 = pnand %p104_p9, %p98_p6 }
  0x17   :  { %108 = shalt.err (!%p105_p10)
}
  0x18   :  { %s139_s0 = smov 128   ;;  %s140_s29 = smov 8  }
  0x19   :  { %29 = dma.hbm_to_vmem [thread:$0]  %s194_s1, 384, %s24_s20, [#allocation3], %s139_s0, %s139_s0, %s140_s29  }
  0x1a   :  { %131 = dma.done.wait [#allocation5], 16  }
  0x1b   :  { %132 = vsyncadd [#allocation5], 4294967280 }
  0x1c   :  { %133 = dma.done.wait [#allocation3], 384  }
  0x1d   :  { %134 = vsyncadd [#allocation3], 4294966912 }
  0x1e   :  { %36 = sfence }
  0x1f   :  { %s37_s4 = sld [smem:[#allocation2]]  ;;  %s70_s5 = sld [smem:[#allocation2 + $0x1]]  ;;  %v40_v0 = vld [vmem:[#allocation6] sm:$0xff]  ;;  %v44_v1 = vld [vmem:[#allocation6 + $0x8] sm:$0xff]  ;;  %v49_v2 = vld [vmem:[#allocation6 + $0x10] sm:$0xff] }
  0x20   :  { %s71_s6 = sld [smem:[#allocation2 + $0x2]]  ;;  %s141_s7 = smov [#allocation7]  }
  0x21   :  { %s60_s8 = sshll.u32 %s141_s7, 4  ;;  %s61_s8 = int_to_ptr.vmem [resolvable:$true] %s60_s8 }
  0x22   :  { %s109_s1 = scalar_lea.vmem %s61_s8, 128  ;;  %p114_p12 = scmp.lt.s32.totalorder %s61_s8, %s61_s8 }
  0x23   :  { %p110_p11 = scmp.ne.s32.totalorder %s61_s8, %s109_s1  ;;  %p115_p13 = scmp.lt.s32.totalorder %s109_s1, %s109_s1 }
  0x25   :  { %v41_v3 = vstv %s37_s4  ;;  %v45_v4 = vstv %s70_s5  ;;  %p116_p0 = por %p115_p13, %p114_p12 }
  0x26   :  { %v42_v5 = vmul.f32 %v41_v3, %v40_v0  ;;  %v46_v6 = vmul.f32 %v45_v4, %v44_v1  ;;  %v50_v7 = vstv %s71_s6 }
  0x27   :  { %v51_v8 = vmul.f32 %v50_v7, %v49_v2  ;;  %p117_p1 = pnand %p116_p0, %p110_p11 }
  0x28   :  { %v47_v9 = vadd.f32 %v46_v6, %v42_v5 }
  0x2a   :  { %v52_v10 = vadd.f32 %v51_v8, %v47_v9 }
  0x2c   :  { %53 = vst [vmem:[#allocation7] sm:$0xff] %v52_v10 }
  0x2d   :  { %120 = shalt.err (!%p117_p1)
}
  0x2e   :  { %s121_s11 = scalar_lea.hbm %s195_s2, 128 }
  0x2f   :  { %p122_p2 = scmp.ne.s32.totalorder %s195_s2, %s121_s11  ;;  %p125_p3 = scmp.lt.u32.totalorder %s121_s11, %s195_s2 }
  0x31   :  { %p127_p4 = pnand %p125_p3, %p122_p2 }
  0x33   :  { %130 = shalt.err (!%p127_p4)
}
  0x34   :  { %63 = dma.vmem_to_hbm [thread:$0]  %s61_s8, 128, %s195_s2, [#allocation4]  }
  0x35   :  { %135 = dma.done.wait [#allocation4], 128  }
  0x36   :  { %136 = vsyncadd [#allocation4], 4294967168 }
  0x37   :  { %67 = vsyncpa [#allocation3], 1 }
  0x38   :  { %68 = vsyncpa [#allocation4], 1 }
  0x39   :  { %69 = vsyncpa [#allocation5], 1 }

</bundles_post_ra>
